<compile_context>
chip_gen: v5e
topology: v5e:2x2
jax: 0.10.0
libtpu: 0.0.40
codegen_flags: <defaults>
</compile_context>

<pallas_src>
import jax
import jax.numpy as jnp
from jax.experimental import pallas as pl
from jax.experimental.pallas import tpu as pltpu


def concat_predictor_kernel(pre_ref, post_ref, w_pre_ref, w_post_ref, b_ref, out_ref):
    # cat(pre, post) @ W == pre @ W[:D] + post @ W[D:] (block-diagonalized in
    # the wrapper), so no in-kernel concatenate and no cross-lane data movement.
    y = jnp.dot(pre_ref[...], w_pre_ref[...], preferred_element_type=jnp.float32)
    y = y + jnp.dot(post_ref[...], w_post_ref[...], preferred_element_type=jnp.float32)
    out_ref[...] = (y + b_ref[...]).astype(out_ref.dtype)


def _block_diag(w, fold):
    """(D, C) -> (fold*D, fold*C) block-diagonal matrix with `w` on the diagonal."""
    D, C = w.shape
    eye = jnp.eye(fold, dtype=w.dtype)
    # (fold, D, fold, C): entry (f, d, g, c) = w[d, c] if f == g else 0.
    return (eye[:, None, :, None] * w[None, :, None, :]).reshape(fold * D, fold * C)


def concat_predictor(pre_embed, post_embed, w, b, *, tm=8192):
    """pre_embed, post_embed: (B, S, D); w: (2*D, C); b: (C,). Returns (B, S, C)."""
    B, S, D = pre_embed.shape
    C = w.shape[1]
    M = B * S
    dtype = pre_embed.dtype

    # Fold factor: pack `fold` rows into the lane axis so the output block is
    # 128 lanes wide (unmasked stores, no lane padding). Fall back to no fold
    # if C does not divide 128.
    fold = (128 // C) if (C <= 128 and 128 % C == 0) else 1

    pre2d = pre_embed.reshape(M, D)
    post2d = post_embed.reshape(M, D)

    Mp = pl.cdiv(M, fold) * fold
    if Mp != M:
        # Only pads up to fold-1 (< 16) rows; never a tile-sized full-array pad.
        pad = Mp - M
        pre2d = jnp.pad(pre2d, ((0, pad), (0, 0)))
        post2d = jnp.pad(post2d, ((0, pad), (0, 0)))

    Mf = Mp // fold        # folded rows
    Kf = fold * D          # folded contraction dim (lane-dense)
    Cf = fold * C          # folded output dim (== 128 when fold = 128 // C)

    # Row-major reshapes: free, no data movement.
    pre_f = pre2d.reshape(Mf, Kf)
    post_f = post2d.reshape(Mf, Kf)

    # Split the Linear(2*D -> C) weight (concat elimination) and block-diagonalize
    # so folded_rows @ W_bd computes per-row x @ w, laid out lane-dense.
    w_pre = _block_diag(w[:D], fold)      # (Kf, Cf)
    w_post = _block_diag(w[D:], fold)     # (Kf, Cf)
    b_f = jnp.tile(b, fold).reshape(1, Cf)

    # Folded row tile (tm is in original rows; default 8192 -> 512 folded rows).
    tmf = max(1, tm // fold)
    if tmf >= Mf:
        tmf = Mf                           # single full-extent block
    else:
        tmf = pl.cdiv(tmf, 8) * 8          # sublane-aligned partial blocks
        tmf = min(tmf, Mf)
    # Keep the grid length >= 2 when there is enough work so both TensorCores
    # on v7x get a share (no-op on single-TC v5e/v6e).
    if Mf >= 16 and pl.cdiv(Mf, tmf) < 2:
        tmf = pl.cdiv(pl.cdiv(Mf, 2), 8) * 8

    grid = (pl.cdiv(Mf, tmf),)

    out_f = pl.pallas_call(
        concat_predictor_kernel,
        out_shape=jax.ShapeDtypeStruct((Mf, Cf), dtype),
        grid_spec=pltpu.PrefetchScalarGridSpec(
            num_scalar_prefetch=0,
            grid=grid,
            in_specs=[
                pl.BlockSpec((tmf, Kf), lambda i: (i, 0)),   # folded pre rows
                pl.BlockSpec((tmf, Kf), lambda i: (i, 0)),   # folded post rows
                pl.BlockSpec((Kf, Cf), lambda i: (0, 0)),    # block-diag w_pre (resident)
                pl.BlockSpec((Kf, Cf), lambda i: (0, 0)),    # block-diag w_post (resident)
                pl.BlockSpec((1, Cf), lambda i: (0, 0)),     # tiled bias (resident)
            ],
            out_specs=pl.BlockSpec((tmf, Cf), lambda i: (i, 0)),
        ),
        compiler_params=pltpu.CompilerParams(
            dimension_semantics=("parallel",),
        ),
    )(pre_f, post_f, w_pre, w_post, b_f)

    # Unfold: (Mf, fold*C) -> (Mp, C) is the exact inverse row packing.
    out2d = out_f.reshape(Mp, C)
    if Mp != M:
        out2d = out2d[:M]
    return out2d.reshape(B, S, C)


if __name__ == "__main__":
    # Small, deterministic example shapes.
    B, S, D, C = 2, 8, 32, 8

    key = jax.random.PRNGKey(0)
    k_pre, k_post, k_w, k_b = jax.random.split(key, 4)

    pre_embed = jax.random.normal(k_pre, (B, S, D), dtype=jnp.float32)
    post_embed = jax.random.normal(k_post, (B, S, D), dtype=jnp.float32)

    # Deterministic Linear(2*D -> C) parameters (synthetic init, no checkpoint).
    bound = 1.0 / jnp.sqrt(2.0 * D)
    w = jax.random.uniform(k_w, (2 * D, C), jnp.float32, -bound, bound)
    b = jax.random.uniform(k_b, (C,), jnp.float32, -bound, bound)

    out = concat_predictor(pre_embed, post_embed, w, b)
    out = jax.block_until_ready(out)

    # Reference (plain JAX) check of the exact semantics:
    # logits = Linear(cat(pre, post, axis=-1))
    x_ref = jnp.concatenate([pre_embed, post_embed], axis=-1)
    ref = x_ref @ w + b
    assert out.shape == (B, S, C)
    assert jnp.allclose(out, ref, atol=1e-5, rtol=1e-5)

    print("KERNEL_OK")
</pallas_src>

<mosaic_0001>
module attributes {stable_mosaic.version = 11 : i64} {
  func.func @concat_predictor_kernel(%arg0: i32, %arg1: memref<1x512xf32, #tpu.memory_space<vmem>>, %arg2: memref<1x512xf32, #tpu.memory_space<vmem>>, %arg3: memref<512x128xf32, #tpu.memory_space<vmem>>, %arg4: memref<512x128xf32, #tpu.memory_space<vmem>>, %arg5: memref<1x128xf32, #tpu.memory_space<vmem>>, %arg6: memref<1x128xf32, #tpu.memory_space<vmem>>) attributes {dimension_semantics = [#tpu.dimension_semantics<parallel>], iteration_bounds = array<i64: 1>, scalar_prefetch = 0 : i64, scratch_operands = 0 : i64, tpu.core_type = #tpu.core_type<tc>, window_params = [{transform_indices = @transform_0, window_bounds = array<i64: 1, 512>}, {transform_indices = @transform_1, window_bounds = array<i64: 1, 512>}, {pipeline_mode = #tpu.pipeline_mode<synchronous>, transform_indices = @transform_2, window_bounds = array<i64: 512, 128>}, {pipeline_mode = #tpu.pipeline_mode<synchronous>, transform_indices = @transform_3, window_bounds = array<i64: 512, 128>}, {pipeline_mode = #tpu.pipeline_mode<synchronous>, transform_indices = @transform_4, window_bounds = array<i64: 1, 128>}, {transform_indices = @transform_5, window_bounds = array<i64: 1, 128>}]} {
    %c0 = arith.constant 0 : index
    %c0_0 = arith.constant 0 : index
    %0 = vector.load %arg1[%c0, %c0_0] : memref<1x512xf32, #tpu.memory_space<vmem>>, vector<1x512xf32>
    %c0_1 = arith.constant 0 : index
    %c0_2 = arith.constant 0 : index
    %1 = vector.load %arg3[%c0_1, %c0_2] : memref<512x128xf32, #tpu.memory_space<vmem>>, vector<512x128xf32>
    %cst = arith.constant dense<0.000000e+00> : vector<1x128xf32>
    %2 = tpu.matmul %0, %1, %cst {dimension_numbers = #tpu.dot_dimension_numbers<[1], [0], [0], [1], [0, 0, 1, 1], [], []>} : vector<1x512xf32>, vector<512x128xf32>, vector<1x128xf32> -> vector<1x128xf32>
    %c0_3 = arith.constant 0 : index
    %c0_4 = arith.constant 0 : index
    %3 = vector.load %arg2[%c0_3, %c0_4] : memref<1x512xf32, #tpu.memory_space<vmem>>, vector<1x512xf32>
    %c0_5 = arith.constant 0 : index
    %c0_6 = arith.constant 0 : index
    %4 = vector.load %arg4[%c0_5, %c0_6] : memref<512x128xf32, #tpu.memory_space<vmem>>, vector<512x128xf32>
    %cst_7 = arith.constant dense<0.000000e+00> : vector<1x128xf32>
    %5 = tpu.matmul %3, %4, %cst_7 {dimension_numbers = #tpu.dot_dimension_numbers<[1], [0], [0], [1], [0, 0, 1, 1], [], []>} : vector<1x512xf32>, vector<512x128xf32>, vector<1x128xf32> -> vector<1x128xf32>
    %6 = arith.addf %2, %5 : vector<1x128xf32>
    %c0_8 = arith.constant 0 : index
    %c0_9 = arith.constant 0 : index
    %7 = vector.load %arg5[%c0_8, %c0_9] : memref<1x128xf32, #tpu.memory_space<vmem>>, vector<1x128xf32>
    %8 = arith.addf %6, %7 : vector<1x128xf32>
    %c0_10 = arith.constant 0 : index
    %c0_11 = arith.constant 0 : index
    %9 = vector.load %arg6[%c0_10, %c0_11] : memref<1x128xf32, #tpu.memory_space<vmem>>, vector<1x128xf32>
    tpu.vector_store %arg6[%c0_10, %c0_11], %8 {strides = array<i32>} : memref<1x128xf32, #tpu.memory_space<vmem>>, vector<1x128xf32>,
    return
  }
  func.func @transform_0(%arg0: i32) -> (i32, i32) {
    %c0_i32 = arith.constant 0 : i32
    %c0_i32_0 = arith.constant 0 : i32
    return %arg0, %c0_i32 : i32, i32
  }
  func.func @transform_1(%arg0: i32) -> (i32, i32) {
    %c0_i32 = arith.constant 0 : i32
    %c0_i32_0 = arith.constant 0 : i32
    return %arg0, %c0_i32 : i32, i32
  }
  func.func @transform_2(%arg0: i32) -> (i32, i32) {
    %c0_i32 = arith.constant 0 : i32
    %c0_i32_0 = arith.constant 0 : i32
    %c0_i32_1 = arith.constant 0 : i32
    return %c0_i32, %c0_i32_0 : i32, i32
  }
  func.func @transform_3(%arg0: i32) -> (i32, i32) {
    %c0_i32 = arith.constant 0 : i32
    %c0_i32_0 = arith.constant 0 : i32
    %c0_i32_1 = arith.constant 0 : i32
    return %c0_i32, %c0_i32_0 : i32, i32
  }
  func.func @transform_4(%arg0: i32) -> (i32, i32) {
    %c0_i32 = arith.constant 0 : i32
    %c0_i32_0 = arith.constant 0 : i32
    %c0_i32_1 = arith.constant 0 : i32
    return %c0_i32, %c0_i32_0 : i32, i32
  }
  func.func @transform_5(%arg0: i32) -> (i32, i32) {
    %c0_i32 = arith.constant 0 : i32
    %c0_i32_0 = arith.constant 0 : i32
    return %arg0, %c0_i32 : i32, i32
  }
}

</mosaic_0001>

<bundles_post_ra>
// kernel: tpu_custom_call.1
= control target key start
LH: loop header
LB: loop body
LE: loop exit
PB: predicated region body
PF: predicated region fallthrough
CT: control target
= control target key end

     0   :  { %10 = vsyncpa [#allocation3], 0  ;;  %s600_s0 = inlined_call_operand.hbm [shape: f32[1,512], index: 0, kind: input, shape index: {}]   ;;  %s601_s1 = inlined_call_operand.hbm [shape: f32[1,512], index: 1, kind: input, shape index: {}]   ;;  %s602_s2 = inlined_call_operand.hbm [shape: f32[512,128], index: 2, kind: input, shape index: {}]   ;;  %s603_s3 = inlined_call_operand.hbm [shape: f32[512,128], index: 3, kind: input, shape index: {}]   ;;  %s604_s4 = inlined_call_operand.vmem [shape: f32[1,128], index: 4, kind: input, shape index: {}]   ;;  %s605_s5 = inlined_call_operand.hbm [shape: f32[1,128], index: 5, kind: output, shape index: {}]  }
   0x1   :  { %11 = vsyncpa [#allocation6], 0 }
   0x2   :  { %12 = vsyncpa [#allocation9], 0  ;;  %s30_s20 = sshll.u32 %s601_s1, 4  ;;  %s31_s20 = int_to_ptr.hbm [resolvable:$true] %s30_s20 }
   0x3   :  { %13 = vsyncpa [#allocation4], 0  ;;  %s545_s21 = smov [#allocation5]   ;;  %s19_s25 = sshll.u32 %s600_s0, 4  ;;  %s20_s25 = int_to_ptr.hbm [resolvable:$true] %s19_s25 }
   0x4   :  { %s32_s22 = sshll.u32 %s545_s21, 4  ;;  %s546_s26 = smov [#allocation2]   ;;  %s33_s22 = int_to_ptr.vmem [resolvable:$true] %s32_s22 }
   0x5   :  { %35 = dma.hbm_to_vmem [thread:$0]  %s31_s20, 64, %s33_s22, [#allocation6]  }
   0x6   :  { %s21_s27 = sshll.u32 %s546_s26, 4  ;;  %s40_s30 = sshll.u32 %s602_s2, 4  ;;  %s22_s27 = int_to_ptr.vmem [resolvable:$true] %s21_s27  ;;  %s41_s30 = int_to_ptr.hbm [resolvable:$true] %s40_s30 }
   0x7   :  { %24 = dma.hbm_to_vmem [thread:$0]  %s20_s25, 64, %s22_s27, [#allocation3]  }
   0x8   :  { %s547_s1 = smov [#allocation7]   ;;  %s53_s9 = sshll.u32 %s603_s3, 4  ;;  %s54_s9 = int_to_ptr.hbm [resolvable:$true] %s53_s9 }
   0x9   :  { %s42_s6 = sshll.u32 %s547_s1, 4  ;;  %s548_s10 = smov 128   ;;  %s43_s6 = int_to_ptr.vmem [resolvable:$true] %s42_s6 }
   0xa   :  { %s549_s0 = smov 8   ;;  %s550_s11 = smov [#allocation8]  }
   0xb   :  { %48 = dma.hbm_to_vmem [thread:$0]  %s41_s30, 8192, %s43_s6, [#allocation6], %s548_s10, %s548_s10, %s549_s0  }
   0xc   :  { %s55_s12 = sshll.u32 %s550_s11, 4  ;;  %s56_s12 = int_to_ptr.vmem [resolvable:$true] %s55_s12 }
   0xd   :  { %61 = dma.hbm_to_vmem [thread:$0]  %s54_s9, 8192, %s56_s12, [#allocation9], %s548_s10, %s548_s10, %s549_s0  }
   0xe   :  { %537 = dma.done.wait [#allocation3], 64  }
   0xf   :  { %538 = vsyncadd [#allocation3], 4294967232 }
  0x10   :  { %539 = dma.done.wait [#allocation6], 8256  }
  0x11   :  { %540 = vsyncadd [#allocation6], 4294959040 }
  0x12   :  { %541 = dma.done.wait [#allocation9], 8192  }
  0x13   :  { %542 = vsyncadd [#allocation9], 4294959104  ;;  %v161_v0 = vld [vmem:[#allocation8 + $0x78] sm:$0xff]  ;;  %v160_v2 = vld [vmem:[#allocation8 + $0x70] sm:$0xff]  ;;  %s551_s13 = smov [#allocation10]   ;;  %s398_s17 = sshll.u32 %s605_s5, 4  ;;  %s399_s17 = int_to_ptr.hbm [resolvable:$true] %s398_s17 }
  0x14   :  { %v193_v1 = vld [vmem:[#allocation8 + $0x178] sm:$0xff]  ;;  %219 = vmatpush.msra.mxu0 %v161_v0  ;;  %v192_v4 = vld [vmem:[#allocation8 + $0x170] sm:$0xff]  ;;  %v159_v6 = vld [vmem:[#allocation8 + $0x68] sm:$0xff]  ;;  %s396_s14 = sshll.u32 %s551_s13, 4  ;;  %s397_s14 = int_to_ptr.vmem [resolvable:$true] %s396_s14 }
  0x15   :  { %259 = vmatpush.msra.mxu2 %v193_v1  ;;  %v177_v3 = vld [vmem:[#allocation8 + $0xf8] sm:$0xff]  ;;  %v176_v7 = vld [vmem:[#allocation8 + $0xf0] sm:$0xff]  ;;  %v191_v8 = vld [vmem:[#allocation8 + $0x168] sm:$0xff] }
  0x16   :  { %v209_v5 = vld [vmem:[#allocation8 + $0x1f8] sm:$0xff]  ;;  %239 = vmatpush.msra.mxu1 %v177_v3  ;;  %220 = vmatpush.msra.mxu0 %v160_v2  ;;  %v208_v9 = vld [vmem:[#allocation8 + $0x1f0] sm:$0xff]  ;;  %v175_v10 = vld [vmem:[#allocation8 + $0xe8] sm:$0xff] }
  0x17   :  { %279 = vmatpush.msra.mxu3 %v209_v5  ;;  %260 = vmatpush.msra.mxu2 %v192_v4  ;;  %v158_v11 = vld [vmem:[#allocation8 + $0x60] sm:$0xff]  ;;  %v207_v13 = vld [vmem:[#allocation8 + $0x1e8] sm:$0xff]  ;;  %v157_v16 = vld [vmem:[#allocation8 + $0x58] sm:$0xff] }
  0x18   :  { %240 = vmatpush.msra.mxu1 %v176_v7  ;;  %v190_v12 = vld [vmem:[#allocation8 + $0x160] sm:$0xff]  ;;  %221 = vmatpush.msra.mxu0 %v159_v6  ;;  %v189_v17 = vld [vmem:[#allocation8 + $0x158] sm:$0xff]  ;;  %v156_v20 = vld [vmem:[#allocation8 + $0x50] sm:$0xff] }
  0x19   :  { %280 = vmatpush.msra.mxu3 %v208_v9  ;;  %261 = vmatpush.msra.mxu2 %v191_v8  ;;  %v174_v14 = vld [vmem:[#allocation8 + $0xe0] sm:$0xff]  ;;  %v173_v18 = vld [vmem:[#allocation8 + $0xd8] sm:$0xff]  ;;  %v188_v21 = vld [vmem:[#allocation8 + $0x150] sm:$0xff] }
  0x1a   :  { %v206_v15 = vld [vmem:[#allocation8 + $0x1e0] sm:$0xff]  ;;  %241 = vmatpush.msra.mxu1 %v175_v10  ;;  %222 = vmatpush.msra.mxu0 %v158_v11  ;;  %v205_v19 = vld [vmem:[#allocation8 + $0x1d8] sm:$0xff]  ;;  %v172_v22 = vld [vmem:[#allocation8 + $0xd0] sm:$0xff] }
  0x1b   :  { %281 = vmatpush.msra.mxu3 %v207_v13  ;;  %262 = vmatpush.msra.mxu2 %v190_v12  ;;  %v204_v23 = vld [vmem:[#allocation8 + $0x1d0] sm:$0xff]  ;;  %v155_v24 = vld [vmem:[#allocation8 + $0x48] sm:$0xff]  ;;  %v154_v28 = vld [vmem:[#allocation8 + $0x40] sm:$0xff] }
  0x1c   :  { %242 = vmatpush.msra.mxu1 %v174_v14  ;;  %223 = vmatpush.msra.mxu0 %v157_v16  ;;  %v187_v25 = vld [vmem:[#allocation8 + $0x148] sm:$0xff]  ;;  %v186_v29 = vld [vmem:[#allocation8 + $0x140] sm:$0xff]  ;;  %v153_v32 = vld [vmem:[#allocation8 + $0x38] sm:$0xff] }
  0x1d   :  { %282 = vmatpush.msra.mxu3 %v206_v15  ;;  %263 = vmatpush.msra.mxu2 %v189_v17  ;;  %v171_v26 = vld [vmem:[#allocation8 + $0xc8] sm:$0xff]  ;;  %v170_v30 = vld [vmem:[#allocation8 + $0xc0] sm:$0xff]  ;;  %v185_v33 = vld [vmem:[#allocation8 + $0x138] sm:$0xff] }
  0x1e   :  { %243 = vmatpush.msra.mxu1 %v173_v18  ;;  %224 = vmatpush.msra.mxu0 %v156_v20  ;;  %v203_v27 = vld [vmem:[#allocation8 + $0x1c8] sm:$0xff]  ;;  %v202_v31 = vld [vmem:[#allocation8 + $0x1c0] sm:$0xff]  ;;  %v169_v34 = vld [vmem:[#allocation8 + $0xb8] sm:$0xff] }
  0x1f   :  { %283 = vmatpush.msra.mxu3 %v205_v19  ;;  %264 = vmatpush.msra.mxu2 %v188_v21  ;;  %v201_v35 = vld [vmem:[#allocation8 + $0x1b8] sm:$0xff]  ;;  %v152_v36 = vld [vmem:[#allocation8 + $0x30] sm:$0xff]  ;;  %v151_v40 = vld [vmem:[#allocation8 + $0x28] sm:$0xff] }
  0x20   :  { %244 = vmatpush.msra.mxu1 %v172_v22  ;;  %225 = vmatpush.msra.mxu0 %v155_v24  ;;  %v184_v37 = vld [vmem:[#allocation8 + $0x130] sm:$0xff]  ;;  %v183_v41 = vld [vmem:[#allocation8 + $0x128] sm:$0xff]  ;;  %v150_v44 = vld [vmem:[#allocation8 + $0x20] sm:$0xff] }
  0x21   :  { %284 = vmatpush.msra.mxu3 %v204_v23  ;;  %265 = vmatpush.msra.mxu2 %v187_v25  ;;  %v168_v38 = vld [vmem:[#allocation8 + $0xb0] sm:$0xff]  ;;  %v167_v42 = vld [vmem:[#allocation8 + $0xa8] sm:$0xff]  ;;  %v182_v45 = vld [vmem:[#allocation8 + $0x120] sm:$0xff] }
  0x22   :  { %245 = vmatpush.msra.mxu1 %v171_v26  ;;  %226 = vmatpush.msra.mxu0 %v154_v28  ;;  %v200_v39 = vld [vmem:[#allocation8 + $0x1b0] sm:$0xff]  ;;  %v199_v43 = vld [vmem:[#allocation8 + $0x1a8] sm:$0xff]  ;;  %v166_v46 = vld [vmem:[#allocation8 + $0xa0] sm:$0xff] }
  0x23   :  { %285 = vmatpush.msra.mxu3 %v203_v27  ;;  %266 = vmatpush.msra.mxu2 %v186_v29  ;;  %v198_v47 = vld [vmem:[#allocation8 + $0x1a0] sm:$0xff]  ;;  %v149_v48 = vld [vmem:[#allocation8 + $0x18] sm:$0xff]  ;;  %v148_v52 = vld [vmem:[#allocation8 + $0x10] sm:$0xff] }
  0x24   :  { %246 = vmatpush.msra.mxu1 %v170_v30  ;;  %227 = vmatpush.msra.mxu0 %v153_v32  ;;  %v181_v49 = vld [vmem:[#allocation8 + $0x118] sm:$0xff]  ;;  %v180_v53 = vld [vmem:[#allocation8 + $0x110] sm:$0xff]  ;;  %v147_v56 = vld [vmem:[#allocation8 + $0x8] sm:$0xff] }
  0x25   :  { %286 = vmatpush.msra.mxu3 %v202_v31  ;;  %267 = vmatpush.msra.mxu2 %v185_v33  ;;  %v165_v50 = vld [vmem:[#allocation8 + $0x98] sm:$0xff]  ;;  %v164_v54 = vld [vmem:[#allocation8 + $0x90] sm:$0xff]  ;;  %v179_v57 = vld [vmem:[#allocation8 + $0x108] sm:$0xff] }
  0x26   :  { %247 = vmatpush.msra.mxu1 %v169_v34  ;;  %228 = vmatpush.msra.mxu0 %v152_v36  ;;  %v197_v51 = vld [vmem:[#allocation8 + $0x198] sm:$0xff]  ;;  %v196_v55 = vld [vmem:[#allocation8 + $0x190] sm:$0xff]  ;;  %v163_v58 = vld [vmem:[#allocation8 + $0x88] sm:$0xff] }
  0x27   :  { %287 = vmatpush.msra.mxu3 %v201_v35  ;;  %268 = vmatpush.msra.mxu2 %v184_v37  ;;  %v195_v59 = vld [vmem:[#allocation8 + $0x188] sm:$0xff]  ;;  %v146_v60 = vld [vmem:[#allocation8] sm:$0xff]  ;;  %v96_v62 = vld [vmem:[#allocation7 + $0x78] sm:$0xff] }
  0x28   :  { %248 = vmatpush.msra.mxu1 %v168_v38  ;;  %229 = vmatpush.msra.mxu0 %v151_v40  ;;  %v178_v61 = vld [vmem:[#allocation8 + $0x100] sm:$0xff]  ;;  %v128_v63 = vld [vmem:[#allocation7 + $0x178] sm:$0xff]  ;;  %v95_v2 = vld [vmem:[#allocation7 + $0x70] sm:$0xff] }
  0x29   :  { %288 = vmatpush.msra.mxu3 %v200_v39  ;;  %269 = vmatpush.msra.mxu2 %v183_v41  ;;  %v162_v0 = vld [vmem:[#allocation8 + $0x80] sm:$0xff]  ;;  %v112_v3 = vld [vmem:[#allocation7 + $0xf8] sm:$0xff]  ;;  %v127_v4 = vld [vmem:[#allocation7 + $0x170] sm:$0xff] }
  0x2a   :  { %249 = vmatpush.msra.mxu1 %v167_v42  ;;  %230 = vmatpush.msra.mxu0 %v150_v44  ;;  %v194_v1 = vld [vmem:[#allocation8 + $0x180] sm:$0xff]  ;;  %v144_v5 = vld [vmem:[#allocation7 + $0x1f8] sm:$0xff]  ;;  %v94_v6 = vld [vmem:[#allocation7 + $0x68] sm:$0xff] }
  0x2b   :  { %289 = vmatpush.msra.mxu3 %v199_v43  ;;  %270 = vmatpush.msra.mxu2 %v182_v45  ;;  %v111_v7 = vld [vmem:[#allocation7 + $0xf0] sm:$0xff]  ;;  %v126_v8 = vld [vmem:[#allocation7 + $0x168] sm:$0xff]  ;;  %v93_v10 = vld [vmem:[#allocation7 + $0x60] sm:$0xff] }
  0x2c   :  { %250 = vmatpush.msra.mxu1 %v166_v46  ;;  %231 = vmatpush.msra.mxu0 %v149_v48  ;;  %v143_v9 = vld [vmem:[#allocation7 + $0x1f0] sm:$0xff]  ;;  %v110_v11 = vld [vmem:[#allocation7 + $0xe8] sm:$0xff]  ;;  %v125_v12 = vld [vmem:[#allocation7 + $0x160] sm:$0xff] }
  0x2d   :  { %290 = vmatpush.msra.mxu3 %v198_v47  ;;  %271 = vmatpush.msra.mxu2 %v181_v49  ;;  %v142_v13 = vld [vmem:[#allocation7 + $0x1e8] sm:$0xff]  ;;  %v92_v14 = vld [vmem:[#allocation7 + $0x58] sm:$0xff]  ;;  %v109_v15 = vld [vmem:[#allocation7 + $0xe0] sm:$0xff] }
  0x2e   :  { %251 = vmatpush.msra.mxu1 %v165_v50  ;;  %232 = vmatpush.msra.mxu0 %v148_v52  ;;  %v124_v16 = vld [vmem:[#allocation7 + $0x158] sm:$0xff]  ;;  %v141_v17 = vld [vmem:[#allocation7 + $0x1e0] sm:$0xff]  ;;  %v91_v18 = vld [vmem:[#allocation7 + $0x50] sm:$0xff] }
  0x2f   :  { %291 = vmatpush.msra.mxu3 %v197_v51  ;;  %272 = vmatpush.msra.mxu2 %v180_v53  ;;  %v108_v19 = vld [vmem:[#allocation7 + $0xd8] sm:$0xff]  ;;  %v123_v20 = vld [vmem:[#allocation7 + $0x150] sm:$0xff]  ;;  %v90_v22 = vld [vmem:[#allocation7 + $0x48] sm:$0xff] }
  0x30   :  { %252 = vmatpush.msra.mxu1 %v164_v54  ;;  %233 = vmatpush.msra.mxu0 %v147_v56  ;;  %v140_v21 = vld [vmem:[#allocation7 + $0x1d8] sm:$0xff]  ;;  %v107_v23 = vld [vmem:[#allocation7 + $0xd0] sm:$0xff]  ;;  %v122_v24 = vld [vmem:[#allocation7 + $0x148] sm:$0xff] }
  0x31   :  { %292 = vmatpush.msra.mxu3 %v196_v55  ;;  %273 = vmatpush.msra.mxu2 %v179_v57  ;;  %v139_v25 = vld [vmem:[#allocation7 + $0x1d0] sm:$0xff]  ;;  %v89_v26 = vld [vmem:[#allocation7 + $0x40] sm:$0xff]  ;;  %v106_v27 = vld [vmem:[#allocation7 + $0xc8] sm:$0xff] }
  0x32   :  { %253 = vmatpush.msra.mxu1 %v163_v58  ;;  %234 = vmatpush.msra.mxu0 %v146_v60  ;;  %v121_v28 = vld [vmem:[#allocation7 + $0x140] sm:$0xff]  ;;  %v138_v29 = vld [vmem:[#allocation7 + $0x1c8] sm:$0xff]  ;;  %v88_v30 = vld [vmem:[#allocation7 + $0x38] sm:$0xff] }
  0x33   :  { %293 = vmatpush.msra.mxu3 %v195_v59  ;;  %274 = vmatpush.msra.mxu2 %v178_v61  ;;  %v105_v31 = vld [vmem:[#allocation7 + $0xc0] sm:$0xff]  ;;  %v120_v32 = vld [vmem:[#allocation7 + $0x138] sm:$0xff]  ;;  %v87_v34 = vld [vmem:[#allocation7 + $0x30] sm:$0xff] }
  0x34   :  { %308 = vmatpush.msrb.mxu0 %v96_v62  ;;  %254 = vmatpush.msra.mxu1 %v162_v0  ;;  %v137_v33 = vld [vmem:[#allocation7 + $0x1c0] sm:$0xff]  ;;  %v104_v35 = vld [vmem:[#allocation7 + $0xb8] sm:$0xff]  ;;  %v119_v37 = vld [vmem:[#allocation7 + $0x130] sm:$0xff] }
  0x35   :  { %348 = vmatpush.msrb.mxu2 %v128_v63  ;;  %294 = vmatpush.msra.mxu3 %v194_v1  ;;  %v145_v36 = vld [vmem:[#allocation5] sm:$0xf]  ;;  %v86_v39 = vld [vmem:[#allocation7 + $0x28] sm:$0xff]  ;;  %v103_v40 = vld [vmem:[#allocation7 + $0xb0] sm:$0xff] }
  0x36   :  { %309 = vmatpush.msrb.mxu0 %v95_v2  ;;  %328 = vmatpush.msrb.mxu1 %v112_v3  ;;  %v136_v38 = vld [vmem:[#allocation7 + $0x1b8] sm:$0xff]  ;;  %v118_v41 = vld [vmem:[#allocation7 + $0x128] sm:$0xff]  ;;  %v135_v42 = vld [vmem:[#allocation7 + $0x1b0] sm:$0xff]  ;;  %v213_v43 = vperm.slane %v145_v36, 2  ;;  %v211_v47 = vperm.slane %v145_v36, 0  ;;  %v214_v49 = vperm.slane %v145_v36, 3 }
  0x37   :  { %349 = vmatpush.msrb.mxu2 %v127_v4  ;;  %368 = vmatpush.msrb.mxu3 %v144_v5  ;;  %v85_v44 = vld [vmem:[#allocation7 + $0x20] sm:$0xff]  ;;  %v102_v45 = vld [vmem:[#allocation7 + $0xa8] sm:$0xff]  ;;  %v84_v50 = vld [vmem:[#allocation7 + $0x18] sm:$0xff]  ;;  %v212_v53 = vperm.slane %v145_v36, 1 }
  0x38   :  { %310 = vmatpush.msrb.mxu0 %v94_v6  ;;  %329 = vmatpush.msrb.mxu1 %v111_v7  ;;  %v117_v46 = vld [vmem:[#allocation7 + $0x120] sm:$0xff]  ;;  %v134_v48 = vld [vmem:[#allocation7 + $0x1a8] sm:$0xff]  ;;  %v116_v52 = vld [vmem:[#allocation7 + $0x118] sm:$0xff] }
  0x39   :  { %350 = vmatpush.msrb.mxu2 %v126_v8  ;;  %369 = vmatpush.msrb.mxu3 %v143_v9  ;;  %v101_v51 = vld [vmem:[#allocation7 + $0xa0] sm:$0xff]  ;;  %v83_v55 = vld [vmem:[#allocation7 + $0x10] sm:$0xff]  ;;  %v100_v56 = vld [vmem:[#allocation7 + $0x98] sm:$0xff] }
  0x3a   :  { %311 = vmatpush.msrb.mxu0 %v93_v10  ;;  %330 = vmatpush.msrb.mxu1 %v110_v11  ;;  %v133_v54 = vld [vmem:[#allocation7 + $0x1a0] sm:$0xff]  ;;  %v115_v57 = vld [vmem:[#allocation7 + $0x110] sm:$0xff]  ;;  %v132_v58 = vld [vmem:[#allocation7 + $0x198] sm:$0xff] }
  0x3b   :  { %351 = vmatpush.msrb.mxu2 %v125_v12  ;;  %370 = vmatpush.msrb.mxu3 %v142_v13  ;;  %v82_v59 = vld [vmem:[#allocation7 + $0x8] sm:$0xff]  ;;  %v99_v60 = vld [vmem:[#allocation7 + $0x90] sm:$0xff]  ;;  %v80_v61 = vld [vmem:[#allocation2] sm:$0xf] }
  0x3c   :  { %312 = vmatpush.msrb.mxu0 %v92_v14  ;;  %331 = vmatpush.msrb.mxu1 %v109_v15  ;;  %v114_v62 = vld [vmem:[#allocation7 + $0x108] sm:$0xff]  ;;  %v131_v63 = vld [vmem:[#allocation7 + $0x190] sm:$0xff]  ;;  %v81_v0 = vld [vmem:[#allocation7] sm:$0xff]  ;;  %v300_v4 = vperm.slane %v80_v61, 0  ;;  %v302_v5 = vperm.slane %v80_v61, 2  ;;  %v301_v8 = vperm.slane %v80_v61, 1 }
  0x3d   :  { %352 = vmatpush.msrb.mxu2 %v124_v16  ;;  %371 = vmatpush.msrb.mxu3 %v141_v17  ;;  %v98_v1 = vld [vmem:[#allocation7 + $0x88] sm:$0xff]  ;;  %v113_v2 = vld [vmem:[#allocation7 + $0x100] sm:$0xff]  ;;  %v303_v9 = vperm.slane %v80_v61, 3 }
  0x3e   :  { %313 = vmatpush.msrb.mxu0 %v91_v18  ;;  %332 = vmatpush.msrb.mxu1 %v108_v19  ;;  %v130_v3 = vld [vmem:[#allocation7 + $0x188] sm:$0xff]  ;;  %v97_v6 = vld [vmem:[#allocation7 + $0x80] sm:$0xff] }
  0x3f   :  { %353 = vmatpush.msrb.mxu2 %v123_v20  ;;  %372 = vmatpush.msrb.mxu3 %v140_v21  ;;  %v129_v7 = vld [vmem:[#allocation7 + $0x180] sm:$0xff] }
  0x40   :  { %314 = vmatpush.msrb.mxu0 %v90_v22  ;;  %333 = vmatpush.msrb.mxu1 %v107_v23 }
  0x41   :  { %354 = vmatpush.msrb.mxu2 %v122_v24  ;;  %373 = vmatpush.msrb.mxu3 %v139_v25  ;;  %v388_v24 = vld [vmem:[%s604_s4] sm:$0x1] }
  0x42   :  { %315 = vmatpush.msrb.mxu0 %v89_v26  ;;  %334 = vmatpush.msrb.mxu1 %v106_v27 }
  0x43   :  { %355 = vmatpush.msrb.mxu2 %v121_v28  ;;  %374 = vmatpush.msrb.mxu3 %v138_v29 }
  0x44   :  { %316 = vmatpush.msrb.mxu0 %v88_v30  ;;  %335 = vmatpush.msrb.mxu1 %v105_v31 }
  0x45   :  { %356 = vmatpush.msrb.mxu2 %v120_v32  ;;  %375 = vmatpush.msrb.mxu3 %v137_v33 }
  0x46   :  { %317 = vmatpush.msrb.mxu0 %v87_v34  ;;  %336 = vmatpush.msrb.mxu1 %v104_v35 }
  0x47   :  { %357 = vmatpush.msrb.mxu2 %v119_v37  ;;  %376 = vmatpush.msrb.mxu3 %v136_v38 }
  0x48   :  { %318 = vmatpush.msrb.mxu0 %v86_v39  ;;  %337 = vmatpush.msrb.mxu1 %v103_v40 }
  0x49   :  { %358 = vmatpush.msrb.mxu2 %v118_v41  ;;  %377 = vmatpush.msrb.mxu3 %v135_v42 }
  0x4a   :  { %275 = vmatmul.f32.vlgmr.msra.gmra.mxu2 %v213_v43  ;;  %319 = vmatpush.msrb.mxu0 %v85_v44 }
  0x4b   :  { %338 = vmatpush.msrb.mxu1 %v102_v45  ;;  %359 = vmatpush.msrb.mxu2 %v117_v46 }
  0x4c   :  { %378 = vmatpush.msrb.mxu3 %v134_v48  ;;  %235 = vmatmul.f32.vlgmr.msra.gmra.mxu0 %v211_v47 }
  0x4d   :  { %295 = vmatmul.f32.vlgmr.msra.gmra.mxu3 %v214_v49  ;;  %320 = vmatpush.msrb.mxu0 %v84_v50 }
  0x4e   :  { %339 = vmatpush.msrb.mxu1 %v101_v51  ;;  %360 = vmatpush.msrb.mxu2 %v116_v52 }
  0x4f   :  { %379 = vmatpush.msrb.mxu3 %v133_v54  ;;  %255 = vmatmul.f32.vlgmr.msra.gmra.mxu1 %v212_v53 }
  0x50   :  { %321 = vmatpush.msrb.mxu0 %v83_v55  ;;  %340 = vmatpush.msrb.mxu1 %v100_v56 }
  0x51   :  { %361 = vmatpush.msrb.mxu2 %v115_v57  ;;  %380 = vmatpush.msrb.mxu3 %v132_v58 }
  0x52   :  { %322 = vmatpush.msrb.mxu0 %v82_v59  ;;  %341 = vmatpush.msrb.mxu1 %v99_v60 }
  0x53   :  { %362 = vmatpush.msrb.mxu2 %v114_v62  ;;  %381 = vmatpush.msrb.mxu3 %v131_v63 }
  0x54   :  { %323 = vmatpush.msrb.mxu0 %v81_v0  ;;  %342 = vmatpush.msrb.mxu1 %v98_v1 }
  0x55   :  { %363 = vmatpush.msrb.mxu2 %v113_v2  ;;  %382 = vmatpush.msrb.mxu3 %v130_v3 }
  0x56   :  { %324 = vmatmul.f32.vlgmr.msrb.gmra.mxu0 %v300_v4  ;;  %364 = vmatmul.f32.vlgmr.msrb.gmra.mxu2 %v302_v5 }
  0x57   :  { %343 = vmatpush.msrb.mxu1 %v97_v6  ;;  %383 = vmatpush.msrb.mxu3 %v129_v7 }
  0x58   :  { %344 = vmatmul.f32.vlgmr.msrb.gmra.mxu1 %v301_v8  ;;  %384 = vmatmul.f32.vlgmr.msrb.gmra.mxu3 %v303_v9 }
  0xc9   :  { %v236_v10 = vpop.f32.mrf.mxu0 }
  0xcc   :  { %v256_v11 = vpop.f32.mrf.mxu1 }
  0xcd   :  { %v257_v12 = vadd.f32 %v256_v11, %v236_v10  ;;  %v276_v13 = vpop.f32.mrf.mxu2 }
  0xcf   :  { %v277_v14 = vadd.f32 %v276_v13, %v257_v12 }
  0xd0   :  { %v296_v15 = vpop.f32.mrf.mxu3 }
  0xd1   :  { %v297_v16 = vadd.f32 %v296_v15, %v277_v14 }
  0xd3   :  { %v325_v17 = vpop.f32.mrf.mxu0 }
  0xd4   :  { %v326_v18 = vadd.f32 %v325_v17, %v297_v16 }
  0xd5   :  { %v345_v19 = vpop.f32.mrf.mxu1 }
  0xd6   :  { %v346_v20 = vadd.f32 %v345_v19, %v326_v18 }
  0xd9   :  { %v365_v21 = vpop.f32.mrf.mxu2 }
  0xda   :  { %v366_v22 = vadd.f32 %v365_v21, %v346_v20 }
  0xdb   :  { %v385_v23 = vpop.f32.mrf.mxu3 }
  0xdc   :  { %v386_v25 = vadd.f32 %v385_v23, %v366_v22 }
  0xde   :  { %v389_v26 = vadd.f32 %v388_v24, %v386_v25 }
  0xe0   :  { %390 = vst [vmem:[#allocation10] sm:$0x1] %v389_v26 }
  0xe1   :  { %401 = dma.vmem_to_hbm [thread:$0]  %s397_s14, 16, %s399_s17, [#allocation4]  }
  0xe2   :  { %543 = dma.done.wait [#allocation4], 16  }
  0xe3   :  { %544 = vsyncadd [#allocation4], 4294967280 }
  0xe4   :  { %406 = vsyncpa [#allocation3], 1 }
  0xe5   :  { %407 = vsyncpa [#allocation6], 1 }
  0xe6   :  { %408 = vsyncpa [#allocation9], 1 }
  0xe7   :  { %409 = vsyncpa [#allocation4], 1 }

</bundles_post_ra>
